<compile_context>
chip_gen: v7x
topology: tpu7x:2x2x1
jax: 0.10.0
libtpu: 0.0.40
codegen_flags: <defaults>
</compile_context>

<pallas_src>
import jax
import jax.numpy as jnp
from jax.experimental import pallas as pl
from jax.experimental.pallas import tpu as pltpu


def _round_up(v, m):
    return -(-v // m) * m


def _cdiv(a, b):
    return -(-a // b)


def _balanced_tile(dim, cap, align):
    """Tile <= cap. Full-dim block if it fits (no alignment/padding needed),
    otherwise a balanced, `align`-multiple tile so padding stays < one tile."""
    if dim <= cap:
        return dim
    nblk = _cdiv(dim, cap)
    return _round_up(_cdiv(dim, nblk), align)


def _matmul_bias_kernel(x_ref, w_ref, b_ref, o_ref):
    """One (tm, tn) tile of x @ w + b, reducing over grid axis 2 (K).

    The f32 output tile is the accumulator: its index_map ignores the K axis,
    so it stays resident in VMEM across the reduction.  Bias is folded into
    the r == 0 initialization; no scratch, no finalize pass.
    """

    @pl.when(pl.program_id(2) == 0)
    def _():
        o_ref[...] = jnp.broadcast_to(b_ref[...], o_ref.shape).astype(o_ref.dtype)

    o_ref[...] += jnp.dot(
        x_ref[...], w_ref[...], preferred_element_type=jnp.float32
    )


def truncated_base_forward(
    x,
    w,
    b,
    *,
    compute_dtype=None,   # e.g. jnp.bfloat16 on v6e/v7x; accumulation stays f32
    force_pallas=False,
    tm_cap=512,
    tn_cap=1024,
    tk_cap=512,
):
    """Computes (x @ w + b)[..., :-1] with a tiled Pallas GEMM.

    x: (batch, seq, K) float32
    w: (K, N)          float32
    b: (N,)            float32
    returns: (batch, seq, N-1) float32
    """
    batch, seq, k = x.shape
    kk, n = w.shape
    assert k == kk
    n_keep = n - 1
    m = batch * seq
    out_dtype = jnp.float32

    if n_keep <= 0:
        return jnp.zeros((batch, seq, 0), dtype=out_dtype)

    # Tiny-problem fast path: fixed pallas_call + per-grid-step overhead and
    # the wrapper plumbing dominate below a few MFLOPs.
    if not force_pallas and (2 * m * k * n) < (1 << 22):
        y = jnp.einsum("bsk,kn->bsn", x, w) + b
        return y[..., :n_keep].astype(out_dtype)

    x2d = x.reshape(m, k)           # leading-dim merge: no copy
    w2d = w                         # full weight; truncation happens on output
    b2d = b.reshape(1, n)

    if compute_dtype is not None:
        x2d = x2d.astype(compute_dtype)
        w2d = w2d.astype(compute_dtype)

    # Tile selection: full-dim blocks when the dim fits (legal regardless of
    # (8,128) divisibility), balanced aligned tiles otherwise.
    tm = _balanced_tile(m, tm_cap, 8)
    tk = _balanced_tile(k, tk_cap, 128)
    tn = _balanced_tile(n, tn_cap, 128)

    mp = _round_up(m, tm)
    kp = _round_up(k, tk)
    np_ = _round_up(n, tn)

    # Keep at least 2 blocks on a "parallel" axis so v7x's second TensorCore
    # has work when the M x N grid would otherwise collapse to one block.
    if (mp // tm) * (np_ // tn) == 1 and m >= 16:
        tm = _round_up(_cdiv(m, 2), 8)
        mp = _round_up(m, tm)

    # Pad only when actually required (zero K-padding contributes nothing to
    # the reduction; padded M rows / N cols are sliced off afterwards).
    if (mp, kp) != (m, k):
        x2d = jnp.pad(x2d, ((0, mp - m), (0, kp - k)))
    if (kp, np_) != (k, n):
        w2d = jnp.pad(w2d, ((0, kp - k), (0, np_ - n)))
    if np_ != n:
        b2d = jnp.pad(b2d, ((0, 0), (0, np_ - n)))

    grid = (mp // tm, np_ // tn, kp // tk)

    itemsize = jnp.dtype(x2d.dtype).itemsize
    cost = pl.CostEstimate(
        flops=2 * mp * kp * np_,
        transcendentals=0,
        # Account for re-streaming: x is read once per N-block, W once per
        # M-block, output written once (advisory only).
        bytes_accessed=itemsize * (mp * kp * grid[1] + kp * np_ * grid[0])
        + 4 * mp * np_,
    )

    # vmem limit from hardware info (v5e/v6e: 128 MiB, v7x: 64 MiB) instead of
    # a hard-coded constant; working set here is ~10 MiB max.
    try:
        info = pltpu.get_tpu_info()
        vmem_cap = int(getattr(info, "vmem_capacity_bytes", 64 * 1024 * 1024))
    except Exception:  # pragma: no cover - conservative fallback
        vmem_cap = 64 * 1024 * 1024
    vmem_limit = max(32 * 1024 * 1024, min((vmem_cap * 3) // 4, 100 * 1024 * 1024))

    out2d = pl.pallas_call(
        _matmul_bias_kernel,
        out_shape=jax.ShapeDtypeStruct((mp, np_), out_dtype),
        grid_spec=pltpu.PrefetchScalarGridSpec(
            num_scalar_prefetch=0,
            grid=grid,
            in_specs=[
                pl.BlockSpec((tm, tk), lambda i, j, r: (i, r)),
                pl.BlockSpec((tk, tn), lambda i, j, r: (r, j)),
                pl.BlockSpec((1, tn), lambda i, j, r: (0, j)),
            ],
            out_specs=pl.BlockSpec((tm, tn), lambda i, j, r: (i, j)),
        ),
        compiler_params=pltpu.CompilerParams(
            dimension_semantics=("parallel", "parallel", "arbitrary"),
            vmem_limit_bytes=vmem_limit,
        ),
        cost_estimate=cost,
    )(x2d, w2d, b2d)

    # The [..., :-1] truncation of the original module, applied on the output.
    return out2d[:m, :n_keep].reshape(batch, seq, n_keep)


if __name__ == "__main__":
    key = jax.random.PRNGKey(0)
    kx, kw, kb, kx2, kw2, kb2 = jax.random.split(key, 6)

    # Small shapes consistent with the module (Linear hidden_in -> hidden_out).
    batch, seq, hidden_in, hidden_out = 2, 8, 32, 32
    x = jax.random.normal(kx, (batch, seq, hidden_in), dtype=jnp.float32)
    w = jax.random.normal(kw, (hidden_in, hidden_out), dtype=jnp.float32) * 0.05
    b = jax.random.normal(kb, (hidden_out,), dtype=jnp.float32) * 0.05

    out = truncated_base_forward(x, w, b, force_pallas=True)
    out = jax.block_until_ready(out)
    ref = (jnp.einsum("bsk,kn->bsn", x, w) + b)[..., :-1]
    assert out.shape == (batch, seq, hidden_out - 1), out.shape
    assert jnp.allclose(out, ref, atol=1e-5, rtol=1e-5)

    # Second small case exercising a multi-step K reduction and a non-128 N.
    b2_, s2_, k2_, n2_ = 2, 16, 384, 160
    x2 = jax.random.normal(kx2, (b2_, s2_, k2_), dtype=jnp.float32)
    w2 = jax.random.normal(kw2, (k2_, n2_), dtype=jnp.float32) * 0.05
    b2 = jax.random.normal(kb2, (n2_,), dtype=jnp.float32) * 0.05

    out2 = truncated_base_forward(x2, w2, b2, force_pallas=True, tk_cap=128)
    out2 = jax.block_until_ready(out2)
    ref2 = (jnp.einsum("bsk,kn->bsn", x2, w2) + b2)[..., :-1]
    assert out2.shape == (b2_, s2_, n2_ - 1), out2.shape
    assert jnp.allclose(out2, ref2, atol=1e-4, rtol=1e-4)

    print("KERNEL_OK")
</pallas_src>

<mosaic_0001>
module attributes {stable_mosaic.version = 11 : i64} {
  func.func @_matmul_bias_kernel(%arg0: i32, %arg1: i32, %arg2: i32, %arg3: memref<8x32xf32, #tpu.memory_space<vmem>>, %arg4: memref<32x32xf32, #tpu.memory_space<vmem>>, %arg5: memref<1x32xf32, #tpu.memory_space<vmem>>, %arg6: memref<8x32xf32, #tpu.memory_space<vmem>>) attributes {dimension_semantics = [#tpu.dimension_semantics<parallel>, #tpu.dimension_semantics<parallel>, #tpu.dimension_semantics<arbitrary>], iteration_bounds = array<i64: 2, 1, 1>, scalar_prefetch = 0 : i64, scratch_operands = 0 : i64, tpu.core_type = #tpu.core_type<tc>, window_params = [{transform_indices = @transform_0, window_bounds = array<i64: 8, 32>}, {transform_indices = @transform_1, window_bounds = array<i64: 32, 32>}, {transform_indices = @transform_2, window_bounds = array<i64: 1, 32>}, {transform_indices = @transform_3, window_bounds = array<i64: 8, 32>}]} {
    %c0_i32 = arith.constant 0 : i32
    %0 = arith.cmpi eq, %arg2, %c0_i32 : i32
    %1 = arith.extui %0 : i1 to i32
    %c0_i32_0 = arith.constant 0 : i32
    %2 = arith.cmpi ne, %1, %c0_i32_0 : i32
    scf.if %2 {
      %c0_8 = arith.constant 0 : index
      %c0_9 = arith.constant 0 : index
      %9 = vector.load %arg5[%c0_8, %c0_9] : memref<1x32xf32, #tpu.memory_space<vmem>>, vector<1x32xf32>
      %10 = vector.shape_cast %9 : vector<1x32xf32> to vector<1x32xf32>
      %11 = vector.broadcast %10 : vector<1x32xf32> to vector<8x32xf32>
      %c0_10 = arith.constant 0 : index
      %c0_11 = arith.constant 0 : index
      %12 = vector.load %arg6[%c0_10, %c0_11] : memref<8x32xf32, #tpu.memory_space<vmem>>, vector<8x32xf32>
      tpu.vector_store %arg6[%c0_10, %c0_11], %11 {strides = array<i32>} : memref<8x32xf32, #tpu.memory_space<vmem>>, vector<8x32xf32>,
    } else {
    }
    %c0 = arith.constant 0 : index
    %c0_1 = arith.constant 0 : index
    %3 = vector.load %arg6[%c0, %c0_1] : memref<8x32xf32, #tpu.memory_space<vmem>>, vector<8x32xf32>
    %c0_2 = arith.constant 0 : index
    %c0_3 = arith.constant 0 : index
    %4 = vector.load %arg3[%c0_2, %c0_3] : memref<8x32xf32, #tpu.memory_space<vmem>>, vector<8x32xf32>
    %c0_4 = arith.constant 0 : index
    %c0_5 = arith.constant 0 : index
    %5 = vector.load %arg4[%c0_4, %c0_5] : memref<32x32xf32, #tpu.memory_space<vmem>>, vector<32x32xf32>
    %cst = arith.constant dense<0.000000e+00> : vector<8x32xf32>
    %6 = tpu.matmul %4, %5, %cst {dimension_numbers = #tpu.dot_dimension_numbers<[1], [0], [0], [1], [0, 0, 1, 1], [], []>} : vector<8x32xf32>, vector<32x32xf32>, vector<8x32xf32> -> vector<8x32xf32>
    %7 = arith.addf %3, %6 : vector<8x32xf32>
    %c0_6 = arith.constant 0 : index
    %c0_7 = arith.constant 0 : index
    %8 = vector.load %arg6[%c0_6, %c0_7] : memref<8x32xf32, #tpu.memory_space<vmem>>, vector<8x32xf32>
    tpu.vector_store %arg6[%c0_6, %c0_7], %7 {strides = array<i32>} : memref<8x32xf32, #tpu.memory_space<vmem>>, vector<8x32xf32>,
    return
  }
  func.func @transform_0(%arg0: i32, %arg1: i32, %arg2: i32) -> (i32, i32) {
    %c0_i32 = arith.constant 0 : i32
    return %arg0, %arg2 : i32, i32
  }
  func.func @transform_1(%arg0: i32, %arg1: i32, %arg2: i32) -> (i32, i32) {
    %c0_i32 = arith.constant 0 : i32
    return %arg2, %arg1 : i32, i32
  }
  func.func @transform_2(%arg0: i32, %arg1: i32, %arg2: i32) -> (i32, i32) {
    %c0_i32 = arith.constant 0 : i32
    %c0_i32_0 = arith.constant 0 : i32
    return %c0_i32, %arg1 : i32, i32
  }
  func.func @transform_3(%arg0: i32, %arg1: i32, %arg2: i32) -> (i32, i32) {
    %c0_i32 = arith.constant 0 : i32
    return %arg0, %arg1 : i32, i32
  }
}

</mosaic_0001>

<bundles_post_ra>
// kernel: tpu_custom_call.1
= control target key start
LH: loop header
LB: loop body
LE: loop exit
PB: predicated region body
PF: predicated region fallthrough
CT: control target
= control target key end

     0   :  { %8 = vsyncpa [#allocation3], 0  ;;  %s982_s0 = inlined_call_operand.hbm [shape: f32[16,32], index: 0, kind: input, shape index: {}]   ;;  %s983_s1 = inlined_call_operand.hbm [shape: f32[32,32], index: 1, kind: input, shape index: {}]   ;;  %s984_s2 = inlined_call_operand.vmem [shape: f32[1,32], index: 2, kind: input, shape index: {}]   ;;  %s985_s3 = inlined_call_operand.hbm [shape: f32[16,32], index: 3, kind: output, shape index: {}]  }
   0x1   :  { %10 = vsyncpa [#allocation3 + $0x1], 0 }
   0x2   :  { %11 = vsyncpa [#allocation6], 0 }
   0x3   :  { %12 = vsyncpa [#allocation4], 0 }
   0x4   :  { %14 = vsyncpa [#allocation4 + $0x1], 0  ;;  %s762_s12 = smov 0   ;;  %s764_s13 = smov 0  }
   0x5   :  { %s766_s14 = smov 0   ;;  %s768_s15 = smov 0  }
   0x6   :  { %s770_s16 = smov 0   ;;  %s772_s17 = smov 0  }
   0x7 LB: > { %s470_s18 = sadd.s32 4294967295, %s732_s17   ;;  %s471_s19 = sadd.s32 4294967294, %s732_s17   ;;  %s732_s17 = sphi %s772_s17, %s20_s17   ;;  %s728_s16 = sphi %s770_s16, %s1009_s16   ;;  %s724_s15 = sphi %s768_s15, %s1008_s15   ;;  %s720_s14 = sphi %s766_s14, %s1007_s14   ;;  %s716_s13 = sphi %s764_s13, %s1006_s13   ;;  %s712_s12 = sphi %s762_s12, %s1005_s12  }
   0x8   : > { %p61_p0 = scmp.ne.s32.totalorder %s716_s13, %s712_s12  ;;  %p796_p1 = scmp.eq.s32.totalorder %s470_s18, 0 }
   0x9   : > { %p800_p2 = scmp.eq.s32.totalorder %s470_s18, 1  ;;  %p147_p3 = scmp.eq.s32.totalorder %s471_s19, 1 }
   0xa   : > { %s990_s20 = scalar_select %p796_p1, 1, 0 }
   0xb   : > { %s991_s21 = scalar_select %p800_p2, 1, 0 }
   0xc   : > { %p806_p4 = por %p796_p1, %p61_p0  ;;  %p472_p5 = scmp.ge.s32.totalorder %s732_s17, 1 }
   0xd   : > { %p811_p6 = por %p147_p3, %p61_p0  ;;  %p154_p7 = scmp.lt.s32.totalorder %s732_s17, 3 }
   0xe   : > { %s992_s22 = scalar_select %p806_p4, 1, 0 }
   0xf   : > { %s993_s23 = scalar_select %p811_p6, 1, 0 }
  0x10   : > { %p816_p8 = pnand %p472_p5, %p154_p7  ;;  %s734_s25 = smov [#allocation5]  }
  0x11   : > { %s170_s26 = sshll.u32 %s734_s25, 4  ;;  %s39_s28 = sadd.s32 1, %s728_s16  ;;  %s171_s26 = int_to_ptr.vmem [resolvable:$true] %s170_s26 }
  0x12   : > { %s994_s24 = scalar_select %p816_p8, 1, 0 }
  0x13   : > { %p518_p9 = pneg %p816_p8  ;;  %s588_s4 = scalar_lea.hbm %s983_s1, 512 }
  0x14   : > { %p589_p12 = scmp.ne.s32.totalorder %s983_s1, %s588_s4  ;;  %p595_p5 = scmp.lt.u32.totalorder %s588_s4, %s983_s1 }
  0x15   : > { %p825_p11 = pnand %p518_p9, %p796_p1 }
  0x17   : > { %p590_p13 = pneg %p825_p11 }
  0x19   : > { %p591_p0 = pnand %p590_p13, %p589_p12 }
  0x1b   : > { %p592_p3 = pneg %p591_p0 }
  0x1d   : > { %p597_p7 = pnand %p595_p5, %p592_p3 }
  0x1f   : > { %600 = shalt.err (!%p597_p7)
}
  0x20   : > { %s601_s9 = scalar_lea.vmem %s171_s26, 512  ;;  %p609_p1 = scmp.lt.s32.totalorder %s171_s26, %s171_s26 }
  0x21   : > { %p602_p9 = scmp.ne.s32.totalorder %s171_s26, %s601_s9  ;;  %p610_p4 = scmp.lt.s32.totalorder %s601_s9, %s601_s9 }
  0x23   : > { %p604_p10 = pnand %p602_p9, %p590_p13  ;;  %p611_p8 = por %p610_p4, %p609_p1 }
  0x25   : > { %p605_p6 = pneg %p604_p10 }
  0x27   : > { %p612_p2 = pnand %p611_p8, %p605_p6 }
  0x29   : > { %615 = shalt.err (!%p612_p2)
}
  0x2a   : > { %s735_s10 = smov 128   ;;  %s736_s11 = smov 8  }
  0x2b   : > { %521 = dma.hbm_to_vmem [thread:$0]  (!%p825_p11), %s983_s1, 512, %s171_s26, [#allocation6], %s735_s10, %s735_s10, %s736_s11  }
  0x2c   : > { %p41_p1 = scmp.ge.s32.totalorder %s39_s28, 2  ;;  %s48_s25 = sadd.s32 1, %s720_s14 }
  0x2d   : > { %p55_p2 = scmp.ne.s32.totalorder %s720_s14, %s716_s13  ;;  %p56_p4 = scmp.eq.s32.totalorder %s732_s17, 0 }
  0x2e   : > { %s1011_s28 = smov (%p41_p1, %s39_s28), 0  ;;  %p997_p8 = scmp.ne.s32.totalorder %s991_s21, 0 }
  0x2f   : > { %p852_p6 = por %p56_p4, %p55_p2  ;;  %s43_s27 = ssub.s32 %s728_s16, %s1011_s28 }
  0x30   : > { %p858_p10 = por %p997_p8, %p55_p2  ;;  %p531_p12 = scmp.lt.s32.totalorder %s732_s17, 2 }
  0x31   : > { %p46_p11 = scmp.eq.s32.totalorder %s43_s27, 0  ;;  %s190_s26 = sand.u32 1, %s720_s14  }
  0x32   : > { %s476_s4 = sshll.u32 %s190_s26, 3  ;;  %s477_s6 = sshll.u32 %s728_s16, 7 }
  0x33   : > { %s867_s5 = scalar_select %p46_p11, %s720_s14, %s48_s25  }
  0x34   : > { %s873_s9 = scalar_lea.hbm %s982_s0, %s477_s6  ;;  %s194_s21 = scalar_lea.vmem [#allocation2], %s476_s4 }
  0x35   : > { %s202_s10 = sshll.u32 %s194_s21, 4  ;;  %p879_p13 = pnand %p531_p12, %p852_p6  ;;  %s875_s10 = int_to_ptr.vmem [resolvable:$true] %s202_s10 }
  0x36   : > { %s191_s18 = scalar_lea.sflag [#allocation3], %s190_s26  ;;  %s616_s19 = scalar_lea.hbm %s873_s9, 128 }
  0x37   : > { %p617_p0 = scmp.ne.s32.totalorder %s873_s9, %s616_s19  ;;  %p618_p3 = pneg %p879_p13 }
  0x38   : > { %s621_s4 = scalar_lea.hbm %s982_s0, 256  ;;  %p622_p9 = scmp.lt.u32.totalorder %s873_s9, %s982_s0 }
  0x39   : > { %p619_p5 = pnand %p618_p3, %p617_p0  ;;  %p623_p1 = scmp.lt.u32.totalorder %s621_s4, %s616_s19 }
  0x3a   : > { %p625_p4 = scmp.lt.u32.totalorder %s616_s19, %s873_s9 }
  0x3b   : > { %p620_p7 = pneg %p619_p5  ;;  %p624_p2 = por %p623_p1, %p622_p9 }
  0x3d   : > { %p626_p6 = por %p625_p4, %p624_p2 }
  0x3f   : > { %p627_p8 = pnand %p626_p6, %p620_p7 }
  0x41   : > { %630 = shalt.err (!%p627_p8)
}
  0x42   : > { %s631_s26 = scalar_lea.vmem %s875_s10, 128  ;;  %s737_s7 = smov [#allocation2]  }
  0x43   : > { %p632_p12 = scmp.ne.s32.totalorder %s875_s10, %s631_s26  ;;  %s636_s8 = sshll.u32 %s737_s7, 4  ;;  %s637_s8 = int_to_ptr.vmem [resolvable:$false] %s636_s8 }
  0x44   : > { %s638_s21 = scalar_lea.vmem %s637_s8, 256  ;;  %p639_p5 = scmp.lt.s32.totalorder %s875_s10, %s637_s8 }
  0x45   : > { %p634_p11 = pnand %p632_p12, %p618_p3  ;;  %p640_p9 = scmp.lt.s32.totalorder %s638_s21, %s631_s26 }
  0x47   : > { %p635_p0 = pneg %p634_p11  ;;  %p641_p1 = por %p640_p9, %p639_p5 }
  0x49   : > { %p642_p2 = pnand %p641_p1, %p635_p0 }
  0x4b   : > { %645 = shalt.err (!%p642_p2)
}
  0x4c   : > { %525 = dma.hbm_to_vmem [thread:$0]  (!%p879_p13), %s873_s9, 128, %s875_s10, %s191_s18  }
  0x4d   : > { %p1000_p7 = scmp.ne.s32.totalorder %s994_s24, 0 }
  0x4e   : > { %s911_s19 = sand.u32 (!%p1000_p7), 1, %s716_s13   ;;  %p1001_p3 = scmp.ne.s32.totalorder (!%p1000_p7), %s992_s22, 0 }
  0x4f   : > { %211 = sbr.rel (%p1000_p7) target bundleno = 329 (0x149), region = 32  ;;  %s479_s25 = sshll.u32 (!%p1000_p7), %s911_s19, 3 }
  0x50   : > { %s214_s27 = scalar_lea.sflag (!%p1000_p7), [#allocation3], %s911_s19  ;;  %s217_s4 = scalar_lea.vmem (!%p1000_p7), [#allocation2], %s479_s25 }
  0x56   : > { %699 = dma.done.wait (%p1001_p3), %s214_s27, 128  }
  0x57   : > { %701 = vsyncadd (%p1001_p3), %s214_s27, 4294967168  ;;  %p1002_p4 = scmp.ne.s32.totalorder %s990_s20, 0 }
  0x59   : > { %703 = dma.done.wait (%p1002_p4), [#allocation6], 512  }
  0x5a   : > { %705 = vsyncadd (%p1002_p4), [#allocation6], 4294966784  ;;  %v738_v0 = vmov 0.0|0.0   ;;  %vm739_vm0 = vmmov 0   ;;  %v740_v1 = vmov 0.0   ;;  %v266_v2 = vld [vmem:[#allocation5] sm:$0xff] }
  0x5b   : > { %504 = vmatprep.subr.bf16.mxu0 %v738_v0  ;;  %501 = vmatprep.mubr.msk.f32.mxu0 %vm739_vm0, %v740_v1  ;;  %v267_v3 = vld [vmem:[#allocation5 + $0x8] sm:$0xff]  ;;  %v268_v4 = vld [vmem:[#allocation5 + $0x10] sm:$0xff]  ;;  %v269_v6 = vld [vmem:[#allocation5 + $0x18] sm:$0xff]  ;;  %vm262_vm1 = vcmask 261120   ;;  %s246_s9 = scalar_lea.vmem [#allocation7], %s479_s25  ;;  %s485_s20 = sshll.u32 %s724_s15, 7 }
  0x5c   : > { %v505_v5 = vpack.c.bf16 %v267_v3, %v266_v2  ;;  %v482_v7 = vld [vmem:[%s984_s2] ss:$0 sm:$0xff]  ;;  %v508_v8 = vpack.c.bf16 %v269_v6, %v268_v4  ;;  %s361_s10 = sshll.u32 %s246_s9, 4  ;;  %s932_s29 = scalar_lea.hbm %s985_s3, %s485_s20  ;;  %s934_s10 = int_to_ptr.vmem [resolvable:$true] %s361_s10 }
  0x5d   : > { %263 = vst.msk [vmem:[%s246_s9] sm:$0xff] %vm262_vm1, %v482_v7  ;;  %v265_v9 = vld [vmem:[%s217_s4] sm:$0xff]  ;;  %s347_s6 = scalar_lea.sflag [#allocation4], %s911_s19  ;;  %s646_s26 = scalar_lea.vmem %s934_s10, 128 }
  0x5e   : > { %506 = vmatpush3.bf16.msra.mxu0 %v505_v5  ;;  %p647_p13 = scmp.ne.s32.totalorder %s934_s10, %s646_s26  ;;  %s741_s15 = smov [#allocation7]  }
  0x5f   : > { %507 = vmatprep.subr.bf16.mxu0 %v738_v0  ;;  %s650_s7 = sshll.u32 %s741_s15, 4  ;;  %s651_s7 = int_to_ptr.vmem [resolvable:$false] %s650_s7 }
  0x60   : > { %p648_p6 = pnand %p647_p13, %p858_p10  ;;  %s652_s8 = scalar_lea.vmem %s651_s7, 256 }
  0x61   : > { %p653_p12 = scmp.lt.s32.totalorder %s934_s10, %s651_s7  ;;  %p654_p11 = scmp.lt.s32.totalorder %s652_s8, %s646_s26 }
  0x62   : > { %509 = vmatpush3.bf16.msra.mxu0 %v508_v8  ;;  %p649_p8 = pneg %p648_p6 }
  0x63   : > { %p655_p0 = por %p654_p11, %p653_p12 }
  0x64   : > { %v264_v10 = vld [vmem:[%s246_s9] sm:$0xff] }
  0x65   : > { %502 = vmatmul.mubr.msk.f32.vlgmr.msra.gmra.mrb[0].mxu0 %vm262_vm1, %v265_v9  ;;  %p656_p5 = pnand %p655_p0, %p649_p8 }
 0x138   : > { %v340_v11 = vpop.f32.mrb[0].mxu0 }
 0x139   : > { %v344_v12 = vadd.f32 %v340_v11, %v264_v10  ;;  %v503_v13 = vpop.f32.mrb[1].mxu0 }
 0x13b   : > { %345 = vst.msk [vmem:[%s246_s9] sm:$0xff] %vm262_vm1, %v344_v12 }
 0x13c   : > { %659 = shalt.err (!%p656_p5)
}
 0x13d   : > { %s660_s21 = scalar_lea.hbm %s932_s29, 128  ;;  %s664_s27 = scalar_lea.hbm %s985_s3, 256 }
 0x13e   : > { %p661_p9 = scmp.ne.s32.totalorder %s932_s29, %s660_s21  ;;  %p665_p7 = scmp.lt.u32.totalorder %s932_s29, %s985_s3 }
 0x13f   : > { %p666_p3 = scmp.lt.u32.totalorder %s664_s27, %s660_s21  ;;  %p668_p13 = scmp.lt.u32.totalorder %s660_s21, %s932_s29 }
 0x140   : > { %p662_p1 = pnand %p661_p9, %p858_p10 }
 0x141   : > { %p667_p4 = por %p666_p3, %p665_p7 }
 0x142   : > { %p663_p2 = pneg %p662_p1 }
 0x143   : > { %p669_p6 = por %p668_p13, %p667_p4 }
 0x145   : > { %p670_p8 = pnand %p669_p6, %p663_p2 }
 0x147   : > { %673 = shalt.err (!%p670_p8)
}
 0x148   : > { %516 = dma.vmem_to_hbm [thread:$0]  (%p858_p10), %s934_s10, 128, %s932_s29, %s347_s6  }
 0x149 PF: > { %s373_s24 = sand.u32 1, %s712_s12   ;;  %p1003_p12 = scmp.ne.s32.totalorder %s993_s23, 0 }
 0x14a   : > { %p1004_p11 = scmp.ge.s32.totalorder %s732_s17, 2  ;;  %s374_s9 = scalar_lea.sflag [#allocation4], %s373_s24 }
 0x14c   : > { %p527_p0 = pnand %p1004_p11, %p1003_p12 }
 0x14e   : > { %707 = dma.done.wait (!%p527_p0), %s374_s9, 128  }
 0x14f   : > { %709 = vsyncadd (!%p527_p0), %s374_s9, 4294967168  ;;  %s20_s17 = sadd.s32 1, %s732_s17   ;;  %s1005_s12 = smov %s716_s13 }
 0x150   : > { %p17_p5 = scmp.ge.s32.totalorder %s20_s17, 4   ;;  %s1006_s13 = smov %s720_s14 }
 0x151   : > { %s1007_s14 = smov %s867_s5  ;;  %s1008_s15 = smov %s728_s16 }
 0x152   : > { %s1009_s16 = smov %s1011_s28  ;;  %19 = sbr.rel (!%p17_p5) target bundleno = 7 (0x7), region = 89 }
 0x159   :  { %379 = vsyncpa [#allocation3], 1 }
 0x15a   :  { %381 = vsyncpa [#allocation3 + $0x1], 1 }
 0x15b   :  { %382 = vsyncpa [#allocation6], 1 }
 0x15c   :  { %383 = vsyncpa [#allocation4], 1 }
 0x15d   :  { %385 = vsyncpa [#allocation4 + $0x1], 1 }

</bundles_post_ra>
